<compile_context>
chip_gen: v5e
topology: v5e:2x2
jax: 0.10.0
libtpu: 0.0.40
codegen_flags: <defaults>
</compile_context>

<pallas_src>
import jax
import jax.numpy as jnp
from jax.experimental import pallas as pl
from jax.experimental.pallas import tpu as pltpu


def _round_up(a, b):
    return (a + b - 1) // b * b


def _rot_head_kernel(x_ref, w_ref, b_ref, out_ref):
    # x_ref  : (TN, TD)     input-feature tile (native dtype)
    # w_ref  : (TD, K_pad)  effective fc weight tile (avg-pool already folded in)
    # b_ref  : (1, K_pad)   fc bias, f32
    # out_ref: (TN, K_pad)  f32 logits; resident across the contraction grid axis.
    @pl.when(pl.program_id(1) == 0)
    def _():
        out_ref[...] = jnp.broadcast_to(b_ref[...], out_ref.shape)

    out_ref[...] += jnp.dot(x_ref[...], w_ref[...],
                            preferred_element_type=jnp.float32)


def rot_head_forward(x, weight, bias, *, with_avg_pool=False,
                     tile_n=256, tile_d=2048):
    """Pallas implementation of RotHead.forward.

    x      : (N, C, H, W) when with_avg_pool else anything flattening to (N, in_channels)
    weight : (num_classes, in_channels)   -- nn.Linear convention
    bias   : (num_classes,)
    Returns [cls_score] with cls_score float32 of shape (N, num_classes),
    matching the PyTorch module's list-of-one-tensor return.
    """
    if isinstance(x, tuple):
        x = x[3]

    num_classes, in_channels = weight.shape

    if with_avg_pool:
        assert x.ndim == 4, f"Tensor must have 4 dims, got: {x.ndim}"
        n, c, h, w = x.shape
        assert c == in_channels, (c, in_channels)
        hw = h * w
        x2 = x.reshape(n, c * hw)
        # Fold AdaptiveAvgPool2d((1,1)) into the weight (built once, streamed per tile):
        #   W_eff[c*hw + s, k] = weight[k, c] / hw
        w_eff = jnp.broadcast_to(
            jnp.transpose(weight)[:, None, :] / hw,
            (c, hw, num_classes)).reshape(c * hw, num_classes)
    else:
        n = x.shape[0]
        x2 = x.reshape(n, -1)
        assert x2.shape[1] == in_channels, (x2.shape, in_channels)
        w_eff = jnp.transpose(weight)

    d = x2.shape[1]

    # Lane-dense output: pad classes to a multiple of 128.
    k_pad = _round_up(num_classes, 128)
    # Tile sizes: TD a multiple of 128 (lanes of x), TN a multiple of 8 (sublanes).
    td = min(_round_up(d, 128), tile_d)
    tn = min(_round_up(n, 8), tile_n)
    d_pad = _round_up(d, td)
    n_pad = _round_up(n, tn)

    x_p = jnp.pad(x2, ((0, n_pad - n), (0, d_pad - d)))
    w_p = jnp.pad(w_eff, ((0, d_pad - d), (0, k_pad - num_classes))).astype(x_p.dtype)
    b_p = jnp.pad(bias.astype(jnp.float32).reshape(1, -1),
                  ((0, 0), (0, k_pad - num_classes)))

    grid = (n_pad // tn, d_pad // td)
    itemsize = jnp.dtype(x_p.dtype).itemsize

    out = pl.pallas_call(
        _rot_head_kernel,
        out_shape=jax.ShapeDtypeStruct((n_pad, k_pad), jnp.float32),
        grid_spec=pltpu.PrefetchScalarGridSpec(
            num_scalar_prefetch=0,
            grid=grid,
            in_specs=[
                pl.BlockSpec((tn, td), lambda i, k: (i, k)),       # x tile (streamed)
                pl.BlockSpec((td, k_pad), lambda i, k: (k, 0)),    # weight tile (streamed)
                pl.BlockSpec((1, k_pad), lambda i, k: (0, 0)),     # bias (resident)
            ],
            out_specs=pl.BlockSpec((tn, k_pad), lambda i, k: (i, 0)),
        ),
        compiler_params=pltpu.CompilerParams(
            dimension_semantics=("parallel", "arbitrary"),
        ),
        cost_estimate=pl.CostEstimate(
            flops=2 * n_pad * d_pad * k_pad,
            bytes_accessed=(n_pad * d_pad * itemsize
                            + grid[0] * d_pad * k_pad * itemsize
                            + n_pad * k_pad * 4),
            transcendentals=0,
        ),
    )(x_p, w_p, b_p)

    cls_score = out[:n, :num_classes]
    return [cls_score]


def init_rot_head_params(key, in_channels, num_classes, std=0.01, bias_val=0.0):
    """Deterministic init matching init_weights(init_linear='normal', std=0.01, bias=0.0)."""
    wkey, _ = jax.random.split(key)
    weight = std * jax.random.normal(wkey, (num_classes, in_channels), dtype=jnp.float32)
    bias = jnp.full((num_classes,), bias_val, dtype=jnp.float32)
    return weight, bias


# TODO(synk): RotHead.loss (CrossEntropyLoss) and generate_bce_weight are training-time
# utilities outside forward(); not implemented as Pallas kernels.

if __name__ == "__main__":
    key = jax.random.PRNGKey(0)
    k_x, k_p = jax.random.split(key)

    # Small shapes consistent with the module (in_channels plays the role of 2048).
    batch, in_channels, spatial, num_classes = 2, 32, 16, 4
    weight, bias = init_rot_head_params(k_p, in_channels, num_classes)

    # --- with_avg_pool=True path: NCHW input ---
    x = jax.random.normal(k_x, (batch, in_channels, spatial, spatial), dtype=jnp.float32)
    cls_pool = jax.block_until_ready(
        rot_head_forward(x, weight, bias, with_avg_pool=True)[0])

    # --- with_avg_pool=False (default) path: already-pooled (N, C, 1, 1) features ---
    x_flat = jax.random.normal(k_x, (batch, in_channels, 1, 1), dtype=jnp.float32)
    cls_nopool = jax.block_until_ready(
        rot_head_forward(x_flat, weight, bias, with_avg_pool=False)[0])

    # Reference checks in plain JAX.
    ref_pool = jnp.mean(x, axis=(2, 3)) @ weight.T + bias
    ref_nopool = x_flat.reshape(batch, -1) @ weight.T + bias

    assert cls_pool.shape == (batch, num_classes)
    assert cls_nopool.shape == (batch, num_classes)
    assert jnp.allclose(cls_pool, ref_pool, atol=1e-4), \
        float(jnp.max(jnp.abs(cls_pool - ref_pool)))
    assert jnp.allclose(cls_nopool, ref_nopool, atol=1e-4), \
        float(jnp.max(jnp.abs(cls_nopool - ref_nopool)))

    print("KERNEL_OK")
</pallas_src>

<mosaic_0001>
module attributes {stable_mosaic.version = 11 : i64} {
  func.func @_rot_head_kernel(%arg0: i32, %arg1: i32, %arg2: memref<8x2048xf32, #tpu.memory_space<vmem>>, %arg3: memref<2048x128xf32, #tpu.memory_space<vmem>>, %arg4: memref<1x128xf32, #tpu.memory_space<vmem>>, %arg5: memref<8x128xf32, #tpu.memory_space<vmem>>) attributes {dimension_semantics = [#tpu.dimension_semantics<parallel>, #tpu.dimension_semantics<arbitrary>], iteration_bounds = array<i64: 1, 4>, scalar_prefetch = 0 : i64, scratch_operands = 0 : i64, tpu.core_type = #tpu.core_type<tc>, window_params = [{transform_indices = @transform_0, window_bounds = array<i64: 8, 2048>}, {transform_indices = @transform_1, window_bounds = array<i64: 2048, 128>}, {pipeline_mode = #tpu.pipeline_mode<synchronous>, transform_indices = @transform_2, window_bounds = array<i64: 1, 128>}, {transform_indices = @transform_3, window_bounds = array<i64: 8, 128>}]} {
    %c0_i32 = arith.constant 0 : i32
    %0 = arith.cmpi eq, %arg1, %c0_i32 : i32
    %1 = arith.extui %0 : i1 to i32
    %c0_i32_0 = arith.constant 0 : i32
    %2 = arith.cmpi ne, %1, %c0_i32_0 : i32
    scf.if %2 {
      %c0_8 = arith.constant 0 : index
      %c0_9 = arith.constant 0 : index
      %9 = vector.load %arg4[%c0_8, %c0_9] : memref<1x128xf32, #tpu.memory_space<vmem>>, vector<1x128xf32>
      %10 = vector.shape_cast %9 : vector<1x128xf32> to vector<1x128xf32>
      %11 = vector.broadcast %10 : vector<1x128xf32> to vector<8x128xf32>
      %c0_10 = arith.constant 0 : index
      %c0_11 = arith.constant 0 : index
      %12 = vector.load %arg5[%c0_10, %c0_11] : memref<8x128xf32, #tpu.memory_space<vmem>>, vector<8x128xf32>
      tpu.vector_store %arg5[%c0_10, %c0_11], %11 {strides = array<i32>} : memref<8x128xf32, #tpu.memory_space<vmem>>, vector<8x128xf32>,
    } else {
    }
    %c0 = arith.constant 0 : index
    %c0_1 = arith.constant 0 : index
    %3 = vector.load %arg5[%c0, %c0_1] : memref<8x128xf32, #tpu.memory_space<vmem>>, vector<8x128xf32>
    %c0_2 = arith.constant 0 : index
    %c0_3 = arith.constant 0 : index
    %4 = vector.load %arg2[%c0_2, %c0_3] : memref<8x2048xf32, #tpu.memory_space<vmem>>, vector<8x2048xf32>
    %c0_4 = arith.constant 0 : index
    %c0_5 = arith.constant 0 : index
    %5 = vector.load %arg3[%c0_4, %c0_5] : memref<2048x128xf32, #tpu.memory_space<vmem>>, vector<2048x128xf32>
    %cst = arith.constant dense<0.000000e+00> : vector<8x128xf32>
    %6 = tpu.matmul %4, %5, %cst {dimension_numbers = #tpu.dot_dimension_numbers<[1], [0], [0], [1], [0, 0, 1, 1], [], []>} : vector<8x2048xf32>, vector<2048x128xf32>, vector<8x128xf32> -> vector<8x128xf32>
    %7 = arith.addf %3, %6 : vector<8x128xf32>
    %c0_6 = arith.constant 0 : index
    %c0_7 = arith.constant 0 : index
    %8 = vector.load %arg5[%c0_6, %c0_7] : memref<8x128xf32, #tpu.memory_space<vmem>>, vector<8x128xf32>
    tpu.vector_store %arg5[%c0_6, %c0_7], %7 {strides = array<i32>} : memref<8x128xf32, #tpu.memory_space<vmem>>, vector<8x128xf32>,
    return
  }
  func.func @transform_0(%arg0: i32, %arg1: i32) -> (i32, i32) {
    %c0_i32 = arith.constant 0 : i32
    return %arg0, %arg1 : i32, i32
  }
  func.func @transform_1(%arg0: i32, %arg1: i32) -> (i32, i32) {
    %c0_i32 = arith.constant 0 : i32
    %c0_i32_0 = arith.constant 0 : i32
    return %arg1, %c0_i32 : i32, i32
  }
  func.func @transform_2(%arg0: i32, %arg1: i32) -> (i32, i32) {
    %c0_i32 = arith.constant 0 : i32
    %c0_i32_0 = arith.constant 0 : i32
    %c0_i32_1 = arith.constant 0 : i32
    return %c0_i32, %c0_i32_0 : i32, i32
  }
  func.func @transform_3(%arg0: i32, %arg1: i32) -> (i32, i32) {
    %c0_i32 = arith.constant 0 : i32
    %c0_i32_0 = arith.constant 0 : i32
    return %arg0, %c0_i32 : i32, i32
  }
}

</mosaic_0001>

<bundles_post_ra>
// kernel: tpu_custom_call.1
= control target key start
LH: loop header
LB: loop body
LE: loop exit
PB: predicated region body
PF: predicated region fallthrough
CT: control target
= control target key end

     0   :  { %8 = vsyncpa [#allocation3], 0  ;;  %s1681_s0 = inlined_call_operand.hbm [shape: f32[8,8192], index: 0, kind: input, shape index: {}]   ;;  %s1682_s1 = inlined_call_operand.hbm [shape: f32[8192,128], index: 1, kind: input, shape index: {}]   ;;  %s1683_s2 = inlined_call_operand.hbm [shape: f32[1,128], index: 2, kind: input, shape index: {}]   ;;  %s1684_s3 = inlined_call_operand.hbm [shape: f32[8,128], index: 3, kind: output, shape index: {}]  }
   0x1   :  { %10 = vsyncpa [#allocation3 + $0x1], 0 }
   0x2   :  { %11 = vsyncpa [#allocation6], 0 }
   0x3   :  { %13 = vsyncpa [#allocation6 + $0x1], 0 }
   0x4   :  { %14 = vsyncpa [#allocation4], 0  ;;  %s1275_s12 = smov 0   ;;  %s1277_s13 = smov 0  }
   0x5   :  { %s1279_s14 = smov 0   ;;  %s1281_s15 = smov 0  }
   0x6   :  { %s1283_s16 = smov 0   ;;  %s1285_s17 = smov 0  }
   0x7 LB: > { %s1304_s18 = sadd.s32 4294967295, %s1249_s17   ;;  %p54_p0 = scmp.ne.s32.totalorder %s1233_s13, %s1229_s12  ;;  %s1249_s17 = sphi %s1285_s17, %s20_s17   ;;  %s1245_s16 = sphi %s1283_s16, %s1693_s16   ;;  %s1241_s15 = sphi %s1281_s15, %s1692_s15   ;;  %s1237_s14 = sphi %s1279_s14, %s1691_s14   ;;  %s1233_s13 = sphi %s1277_s13, %s1690_s13   ;;  %s1229_s12 = sphi %s1275_s12, %s1689_s12  }
   0x8   : > { %p55_p1 = scmp.eq.s32.totalorder %s1304_s18, 0  ;;  %p968_p2 = scmp.ge.s32.totalorder %s1249_s17, 1 }
   0x9   : > { %p138_p3 = scmp.lt.s32.totalorder %s1249_s17, 5  ;;  %s150_s22 = sshll.u32 %s1683_s2, 4  ;;  %s151_s22 = int_to_ptr.hbm [resolvable:$true] %s150_s22 }
   0xa   : > { %p1312_p4 = por %p55_p1, %p54_p0  ;;  %s1251_s24 = smov [#allocation7]  }
   0xb   : > { %p1319_p5 = pnand %p968_p2, %p138_p3  ;;  %s152_s25 = sshll.u32 %s1251_s24, 4  ;;  %s153_s25 = int_to_ptr.vmem [resolvable:$true] %s152_s25 }
   0xc   : > { %s29_s26 = sadd.s32 1, %s1245_s16  ;;  %s41_s27 = sadd.s32 1, %s1237_s14 }
   0xd   : > { %p1000_p6 = pneg %p1319_p5  ;;  %p30_p8 = scmp.ge.s32.totalorder %s29_s26, 4 }
   0xe   : > { %p48_p9 = scmp.ne.s32.totalorder %s1237_s14, %s1233_s13  ;;  %p49_p10 = scmp.eq.s32.totalorder %s1249_s17, 0 }
   0xf   : > { %p1001_p7 = pnand %p1000_p6, %p55_p1  ;;  %s1695_s26 = smov (%p30_p8, %s29_s26), 0 }
  0x10   : > { %p1334_p11 = por %p49_p10, %p48_p9  ;;  %p1012_p12 = scmp.lt.s32.totalorder %s1249_s17, 4 }
  0x11   : > { %1003 = dma.hbm_to_vmem [thread:$0]  (!%p1001_p7), %s151_s22, 16, %s153_s25, [#allocation6]  }
  0x12   : > { %s37_s29 = ssub.s32 %s1245_s16, %s1695_s26  ;;  %s163_s30 = sand.u32 1, %s1237_s14  }
  0x13   : > { %p39_p13 = scmp.eq.s32.totalorder %s37_s29, 0  ;;  %s971_s4 = sshll.u32 %s163_s30, 7 }
  0x14   : > { %s986_s5 = sshll.u32 %s1245_s16, 7  ;;  %s167_s11 = scalar_lea.vmem [#allocation2], %s971_s4 }
  0x15   : > { %s1344_s6 = scalar_select %p39_p13, %s1237_s14, %s41_s27  }
  0x16   : > { %s174_s9 = scalar_lea.hbm %s1681_s0, %s986_s5  ;;  %s178_s12 = sshll.u32 %s167_s11, 4  ;;  %s179_s12 = int_to_ptr.vmem [resolvable:$true] %s178_s12 }
  0x17   : > { %s176_s10 = sshll.u32 %s174_s9, 4  ;;  %p1353_p0 = pnand %p1012_p12, %p1334_p11  ;;  %s177_s10 = int_to_ptr.hbm [resolvable:$true] %s176_s10 }
  0x18   : > { %s974_s21 = sshll.u32 %s163_s30, 11  ;;  %s987_s22 = sshll.u32 %s1245_s16, 11 }
  0x19   : > { %s189_s24 = scalar_lea.vmem [#allocation5], %s974_s21  ;;  %s164_s27 = scalar_lea.sflag [#allocation3], %s163_s30 }
  0x1a   : > { %s197_s25 = sshll.u32 %s189_s24, 4  ;;  %s185_s29 = sand.u32 1, %s1249_s17   ;;  %s198_s25 = int_to_ptr.vmem [resolvable:$true] %s197_s25 }
  0x1b   : > { %1007 = dma.hbm_to_vmem [thread:$0]  (!%p1353_p0), %s177_s10, 2048, %s179_s12, %s164_s27  }
  0x1c   : > { %s194_s28 = scalar_lea.hbm %s1682_s1, %s987_s22  ;;  %s186_s8 = scalar_lea.sflag [#allocation6], %s185_s29 }
  0x1d   : > { %s195_s7 = sshll.u32 %s194_s28, 4  ;;  %s1252_s9 = smov 128   ;;  %s196_s7 = int_to_ptr.hbm [resolvable:$true] %s195_s7 }
  0x1e   : > { %s1253_s11 = smov 8   ;;  %209 = sbr.rel (%p1319_p5) target bundleno = 327 (0x147), region = 32 }
  0x1f   : > { %1010 = dma.hbm_to_vmem [thread:$0]  (!%p1353_p0), %s196_s7, 32768, %s198_s25, %s186_s8, %s1252_s9, %s1252_s9, %s1253_s11  }
  0x20   : > { %s211_s30 = sand.u32 (!%p1319_p5), 1, %s1233_s13  }
  0x21   : > { %s978_s10 = sshll.u32 (!%p1319_p5), %s211_s30, 7  ;;  %s212_s12 = scalar_lea.sflag (!%p1319_p5), [#allocation3], %s211_s30 }
  0x22   : > { %s1369_s21 = scalar_lea.vmem (!%p1319_p5), [#allocation2], %s978_s10 }
  0x23   : > { %1212 = dma.done.wait (%p1312_p4), %s212_s12, 2048  }
  0x24   : > { %1214 = vsyncadd (%p1312_p4), %s212_s12, 4294965248  ;;  %s221_s22 = sand.u32 1, %s1304_s18   ;;  %s979_s20 = sshll.u32 %s211_s30, 11 }
  0x25   : > { %s222_s24 = scalar_lea.sflag [#allocation6], %s221_s22  ;;  %s1376_s25 = scalar_lea.vmem [#allocation5], %s979_s20 }
  0x26   : > { %1216 = dma.done.wait (%p1312_p4), %s222_s24, 32768  }
  0x27   : > { %1218 = vsyncadd (%p1312_p4), %s222_s24, 4294934528 }
  0x28   : > { %1220 = dma.done.wait (%p55_p1), [#allocation6], 16  }
  0x29   : > { %1222 = vsyncadd (%p55_p1), [#allocation6], 4294967280  ;;  %p981_p2 = scmp.ne.s32.totalorder %s1241_s15, 0 }
  0x2b   : > { %259 = sbr.rel (%p981_p2) target bundleno = 50 (0x32), region = 48 }
  0x30   : > { %v1068_v0 = vld [vmem:[#allocation7] ss:$0 sm:$0xff] }
  0x31   : > { %264 = vst [vmem:[#allocation8] sm:$0xff] %v1068_v0 }
  0x32 PF: > { %v297_v1 = vld [vmem:[%s1376_s25 + $0x78] sm:$0xff]  ;;  %v296_v3 = vld [vmem:[%s1376_s25 + $0x70] sm:$0xff]  ;;  %v295_v7 = vld [vmem:[%s1376_s25 + $0x68] sm:$0xff]  ;;  %s1254_s15 = smov [#allocation8]   ;;  %s870_s29 = sshll.u32 %s1684_s3, 4  ;;  %s871_s29 = int_to_ptr.hbm [resolvable:$true] %s870_s29 }
  0x33   : > { %v329_v2 = vld [vmem:[%s1376_s25 + $0x178] sm:$0xff]  ;;  %538 = vmatpush.msra.mxu0 %v297_v1  ;;  %v328_v5 = vld [vmem:[%s1376_s25 + $0x170] sm:$0xff]  ;;  %v327_v9 = vld [vmem:[%s1376_s25 + $0x168] sm:$0xff]  ;;  %s868_s19 = sshll.u32 %s1254_s15, 4  ;;  %p1014_p1 = scmp.eq.s32.totalorder %s1304_s18, 3  ;;  %s869_s19 = int_to_ptr.vmem [resolvable:$true] %s868_s19 }
  0x34   : > { %578 = vmatpush.msra.mxu2 %v329_v2  ;;  %v313_v4 = vld [vmem:[%s1376_s25 + $0xf8] sm:$0xff]  ;;  %v312_v8 = vld [vmem:[%s1376_s25 + $0xf0] sm:$0xff]  ;;  %v311_v11 = vld [vmem:[%s1376_s25 + $0xe8] sm:$0xff] }
  0x35   : > { %v345_v6 = vld [vmem:[%s1376_s25 + $0x1f8] sm:$0xff]  ;;  %558 = vmatpush.msra.mxu1 %v313_v4  ;;  %539 = vmatpush.msra.mxu0 %v296_v3  ;;  %v344_v10 = vld [vmem:[%s1376_s25 + $0x1f0] sm:$0xff]  ;;  %v294_v12 = vld [vmem:[%s1376_s25 + $0x60] sm:$0xff] }
  0x36   : > { %598 = vmatpush.msra.mxu3 %v345_v6  ;;  %579 = vmatpush.msra.mxu2 %v328_v5  ;;  %v326_v13 = vld [vmem:[%s1376_s25 + $0x160] sm:$0xff]  ;;  %v343_v14 = vld [vmem:[%s1376_s25 + $0x1e8] sm:$0xff]  ;;  %v293_v17 = vld [vmem:[%s1376_s25 + $0x58] sm:$0xff] }
  0x37   : > { %559 = vmatpush.msra.mxu1 %v312_v8  ;;  %540 = vmatpush.msra.mxu0 %v295_v7  ;;  %v310_v15 = vld [vmem:[%s1376_s25 + $0xe0] sm:$0xff]  ;;  %v325_v18 = vld [vmem:[%s1376_s25 + $0x158] sm:$0xff]  ;;  %v292_v21 = vld [vmem:[%s1376_s25 + $0x50] sm:$0xff] }
  0x38   : > { %599 = vmatpush.msra.mxu3 %v344_v10  ;;  %580 = vmatpush.msra.mxu2 %v327_v9  ;;  %v342_v16 = vld [vmem:[%s1376_s25 + $0x1e0] sm:$0xff]  ;;  %v309_v19 = vld [vmem:[%s1376_s25 + $0xd8] sm:$0xff]  ;;  %v324_v22 = vld [vmem:[%s1376_s25 + $0x150] sm:$0xff] }
  0x39   : > { %560 = vmatpush.msra.mxu1 %v311_v11  ;;  %541 = vmatpush.msra.mxu0 %v294_v12  ;;  %v341_v20 = vld [vmem:[%s1376_s25 + $0x1d8] sm:$0xff]  ;;  %v308_v23 = vld [vmem:[%s1376_s25 + $0xd0] sm:$0xff]  ;;  %v291_v25 = vld [vmem:[%s1376_s25 + $0x48] sm:$0xff] }
  0x3a   : > { %600 = vmatpush.msra.mxu3 %v343_v14  ;;  %581 = vmatpush.msra.mxu2 %v326_v13  ;;  %v340_v24 = vld [vmem:[%s1376_s25 + $0x1d0] sm:$0xff]  ;;  %v323_v26 = vld [vmem:[%s1376_s25 + $0x148] sm:$0xff]  ;;  %v290_v29 = vld [vmem:[%s1376_s25 + $0x40] sm:$0xff] }
  0x3b   : > { %561 = vmatpush.msra.mxu1 %v310_v15  ;;  %542 = vmatpush.msra.mxu0 %v293_v17  ;;  %v307_v27 = vld [vmem:[%s1376_s25 + $0xc8] sm:$0xff]  ;;  %v322_v30 = vld [vmem:[%s1376_s25 + $0x140] sm:$0xff]  ;;  %v289_v33 = vld [vmem:[%s1376_s25 + $0x38] sm:$0xff] }
  0x3c   : > { %601 = vmatpush.msra.mxu3 %v342_v16  ;;  %582 = vmatpush.msra.mxu2 %v325_v18  ;;  %v339_v28 = vld [vmem:[%s1376_s25 + $0x1c8] sm:$0xff]  ;;  %v306_v31 = vld [vmem:[%s1376_s25 + $0xc0] sm:$0xff]  ;;  %v321_v34 = vld [vmem:[%s1376_s25 + $0x138] sm:$0xff] }
  0x3d   : > { %562 = vmatpush.msra.mxu1 %v309_v19  ;;  %543 = vmatpush.msra.mxu0 %v292_v21  ;;  %v338_v32 = vld [vmem:[%s1376_s25 + $0x1c0] sm:$0xff]  ;;  %v305_v35 = vld [vmem:[%s1376_s25 + $0xb8] sm:$0xff]  ;;  %v288_v37 = vld [vmem:[%s1376_s25 + $0x30] sm:$0xff] }
  0x3e   : > { %602 = vmatpush.msra.mxu3 %v341_v20  ;;  %583 = vmatpush.msra.mxu2 %v324_v22  ;;  %v337_v36 = vld [vmem:[%s1376_s25 + $0x1b8] sm:$0xff]  ;;  %v320_v38 = vld [vmem:[%s1376_s25 + $0x130] sm:$0xff]  ;;  %v287_v41 = vld [vmem:[%s1376_s25 + $0x28] sm:$0xff] }
  0x3f   : > { %563 = vmatpush.msra.mxu1 %v308_v23  ;;  %544 = vmatpush.msra.mxu0 %v291_v25  ;;  %v304_v39 = vld [vmem:[%s1376_s25 + $0xb0] sm:$0xff]  ;;  %v319_v42 = vld [vmem:[%s1376_s25 + $0x128] sm:$0xff]  ;;  %v286_v45 = vld [vmem:[%s1376_s25 + $0x20] sm:$0xff] }
  0x40   : > { %603 = vmatpush.msra.mxu3 %v340_v24  ;;  %584 = vmatpush.msra.mxu2 %v323_v26  ;;  %v336_v40 = vld [vmem:[%s1376_s25 + $0x1b0] sm:$0xff]  ;;  %v303_v43 = vld [vmem:[%s1376_s25 + $0xa8] sm:$0xff]  ;;  %v318_v46 = vld [vmem:[%s1376_s25 + $0x120] sm:$0xff] }
  0x41   : > { %564 = vmatpush.msra.mxu1 %v307_v27  ;;  %545 = vmatpush.msra.mxu0 %v290_v29  ;;  %v335_v44 = vld [vmem:[%s1376_s25 + $0x1a8] sm:$0xff]  ;;  %v302_v47 = vld [vmem:[%s1376_s25 + $0xa0] sm:$0xff]  ;;  %v285_v49 = vld [vmem:[%s1376_s25 + $0x18] sm:$0xff] }
  0x42   : > { %604 = vmatpush.msra.mxu3 %v339_v28  ;;  %585 = vmatpush.msra.mxu2 %v322_v30  ;;  %v334_v48 = vld [vmem:[%s1376_s25 + $0x1a0] sm:$0xff]  ;;  %v317_v50 = vld [vmem:[%s1376_s25 + $0x118] sm:$0xff]  ;;  %v284_v53 = vld [vmem:[%s1376_s25 + $0x10] sm:$0xff] }
  0x43   : > { %565 = vmatpush.msra.mxu1 %v306_v31  ;;  %546 = vmatpush.msra.mxu0 %v289_v33  ;;  %v301_v51 = vld [vmem:[%s1376_s25 + $0x98] sm:$0xff]  ;;  %v316_v54 = vld [vmem:[%s1376_s25 + $0x110] sm:$0xff]  ;;  %v283_v57 = vld [vmem:[%s1376_s25 + $0x8] sm:$0xff] }
  0x44   : > { %605 = vmatpush.msra.mxu3 %v338_v32  ;;  %586 = vmatpush.msra.mxu2 %v321_v34  ;;  %v333_v52 = vld [vmem:[%s1376_s25 + $0x198] sm:$0xff]  ;;  %v300_v55 = vld [vmem:[%s1376_s25 + $0x90] sm:$0xff]  ;;  %v315_v58 = vld [vmem:[%s1376_s25 + $0x108] sm:$0xff] }
  0x45   : > { %566 = vmatpush.msra.mxu1 %v305_v35  ;;  %547 = vmatpush.msra.mxu0 %v288_v37  ;;  %v332_v56 = vld [vmem:[%s1376_s25 + $0x190] sm:$0xff]  ;;  %v299_v59 = vld [vmem:[%s1376_s25 + $0x88] sm:$0xff]  ;;  %v282_v61 = vld [vmem:[%s1376_s25] sm:$0xff] }
  0x46   : > { %606 = vmatpush.msra.mxu3 %v337_v36  ;;  %587 = vmatpush.msra.mxu2 %v320_v38  ;;  %v331_v60 = vld [vmem:[%s1376_s25 + $0x188] sm:$0xff]  ;;  %v314_v62 = vld [vmem:[%s1376_s25 + $0x100] sm:$0xff]  ;;  %v361_v63 = vld [vmem:[%s1376_s25 + $0x278] sm:$0xff] }
  0x47   : > { %567 = vmatpush.msra.mxu1 %v304_v39  ;;  %548 = vmatpush.msra.mxu0 %v287_v41  ;;  %v393_v0 = vld [vmem:[%s1376_s25 + $0x378] sm:$0xff]  ;;  %v298_v1 = vld [vmem:[%s1376_s25 + $0x80] sm:$0xff]  ;;  %v360_v3 = vld [vmem:[%s1376_s25 + $0x270] sm:$0xff] }
  0x48   : > { %607 = vmatpush.msra.mxu3 %v336_v40  ;;  %588 = vmatpush.msra.mxu2 %v319_v42  ;;  %v330_v2 = vld [vmem:[%s1376_s25 + $0x180] sm:$0xff]  ;;  %v377_v4 = vld [vmem:[%s1376_s25 + $0x2f8] sm:$0xff]  ;;  %v392_v5 = vld [vmem:[%s1376_s25 + $0x370] sm:$0xff] }
  0x49   : > { %568 = vmatpush.msra.mxu1 %v303_v43  ;;  %549 = vmatpush.msra.mxu0 %v286_v45  ;;  %v409_v6 = vld [vmem:[%s1376_s25 + $0x3f8] sm:$0xff]  ;;  %v359_v7 = vld [vmem:[%s1376_s25 + $0x268] sm:$0xff]  ;;  %v376_v8 = vld [vmem:[%s1376_s25 + $0x2f0] sm:$0xff] }
  0x4a   : > { %608 = vmatpush.msra.mxu3 %v335_v44  ;;  %589 = vmatpush.msra.mxu2 %v318_v46  ;;  %v391_v9 = vld [vmem:[%s1376_s25 + $0x368] sm:$0xff]  ;;  %v408_v10 = vld [vmem:[%s1376_s25 + $0x3f0] sm:$0xff]  ;;  %v358_v11 = vld [vmem:[%s1376_s25 + $0x260] sm:$0xff] }
  0x4b   : > { %569 = vmatpush.msra.mxu1 %v302_v47  ;;  %550 = vmatpush.msra.mxu0 %v285_v49  ;;  %v375_v12 = vld [vmem:[%s1376_s25 + $0x2e8] sm:$0xff]  ;;  %v390_v13 = vld [vmem:[%s1376_s25 + $0x360] sm:$0xff]  ;;  %v357_v15 = vld [vmem:[%s1376_s25 + $0x258] sm:$0xff] }
  0x4c   : > { %609 = vmatpush.msra.mxu3 %v334_v48  ;;  %590 = vmatpush.msra.mxu2 %v317_v50  ;;  %v407_v14 = vld [vmem:[%s1376_s25 + $0x3e8] sm:$0xff]  ;;  %v374_v16 = vld [vmem:[%s1376_s25 + $0x2e0] sm:$0xff]  ;;  %v389_v17 = vld [vmem:[%s1376_s25 + $0x358] sm:$0xff] }
  0x4d   : > { %570 = vmatpush.msra.mxu1 %v301_v51  ;;  %551 = vmatpush.msra.mxu0 %v284_v53  ;;  %v406_v18 = vld [vmem:[%s1376_s25 + $0x3e0] sm:$0xff]  ;;  %v356_v19 = vld [vmem:[%s1376_s25 + $0x250] sm:$0xff]  ;;  %v373_v20 = vld [vmem:[%s1376_s25 + $0x2d8] sm:$0xff] }
  0x4e   : > { %610 = vmatpush.msra.mxu3 %v333_v52  ;;  %591 = vmatpush.msra.mxu2 %v316_v54  ;;  %v388_v21 = vld [vmem:[%s1376_s25 + $0x350] sm:$0xff]  ;;  %v405_v22 = vld [vmem:[%s1376_s25 + $0x3d8] sm:$0xff]  ;;  %v355_v23 = vld [vmem:[%s1376_s25 + $0x248] sm:$0xff] }
  0x4f   : > { %571 = vmatpush.msra.mxu1 %v300_v55  ;;  %552 = vmatpush.msra.mxu0 %v283_v57  ;;  %v372_v24 = vld [vmem:[%s1376_s25 + $0x2d0] sm:$0xff]  ;;  %v387_v25 = vld [vmem:[%s1376_s25 + $0x348] sm:$0xff]  ;;  %v354_v27 = vld [vmem:[%s1376_s25 + $0x240] sm:$0xff] }
  0x50   : > { %611 = vmatpush.msra.mxu3 %v332_v56  ;;  %592 = vmatpush.msra.mxu2 %v315_v58  ;;  %v404_v26 = vld [vmem:[%s1376_s25 + $0x3d0] sm:$0xff]  ;;  %v371_v28 = vld [vmem:[%s1376_s25 + $0x2c8] sm:$0xff]  ;;  %v386_v29 = vld [vmem:[%s1376_s25 + $0x340] sm:$0xff] }
  0x51   : > { %572 = vmatpush.msra.mxu1 %v299_v59  ;;  %553 = vmatpush.msra.mxu0 %v282_v61  ;;  %v403_v30 = vld [vmem:[%s1376_s25 + $0x3c8] sm:$0xff]  ;;  %v353_v31 = vld [vmem:[%s1376_s25 + $0x238] sm:$0xff]  ;;  %v370_v32 = vld [vmem:[%s1376_s25 + $0x2c0] sm:$0xff] }
  0x52   : > { %612 = vmatpush.msra.mxu3 %v331_v60  ;;  %593 = vmatpush.msra.mxu2 %v314_v62  ;;  %v385_v33 = vld [vmem:[%s1376_s25 + $0x338] sm:$0xff]  ;;  %v402_v34 = vld [vmem:[%s1376_s25 + $0x3c0] sm:$0xff]  ;;  %v352_v35 = vld [vmem:[%s1376_s25 + $0x230] sm:$0xff] }
  0x53   : > { %618 = vmatpush.msrb.mxu0 %v361_v63  ;;  %573 = vmatpush.msra.mxu1 %v298_v1  ;;  %v369_v36 = vld [vmem:[%s1376_s25 + $0x2b8] sm:$0xff]  ;;  %v384_v37 = vld [vmem:[%s1376_s25 + $0x330] sm:$0xff]  ;;  %v351_v39 = vld [vmem:[%s1376_s25 + $0x228] sm:$0xff] }
  0x54   : > { %658 = vmatpush.msrb.mxu2 %v393_v0  ;;  %613 = vmatpush.msra.mxu3 %v330_v2  ;;  %v401_v38 = vld [vmem:[%s1376_s25 + $0x3b8] sm:$0xff]  ;;  %v368_v40 = vld [vmem:[%s1376_s25 + $0x2b0] sm:$0xff]  ;;  %v383_v41 = vld [vmem:[%s1376_s25 + $0x328] sm:$0xff] }
  0x55   : > { %619 = vmatpush.msrb.mxu0 %v360_v3  ;;  %638 = vmatpush.msrb.mxu1 %v377_v4  ;;  %v400_v42 = vld [vmem:[%s1376_s25 + $0x3b0] sm:$0xff]  ;;  %v350_v43 = vld [vmem:[%s1376_s25 + $0x220] sm:$0xff]  ;;  %v367_v44 = vld [vmem:[%s1376_s25 + $0x2a8] sm:$0xff] }
  0x56   : > { %659 = vmatpush.msrb.mxu2 %v392_v5  ;;  %678 = vmatpush.msrb.mxu3 %v409_v6  ;;  %v382_v45 = vld [vmem:[%s1376_s25 + $0x320] sm:$0xff]  ;;  %v399_v46 = vld [vmem:[%s1376_s25 + $0x3a8] sm:$0xff]  ;;  %v349_v47 = vld [vmem:[%s1376_s25 + $0x218] sm:$0xff] }
  0x57   : > { %620 = vmatpush.msrb.mxu0 %v359_v7  ;;  %639 = vmatpush.msrb.mxu1 %v376_v8  ;;  %v366_v48 = vld [vmem:[%s1376_s25 + $0x2a0] sm:$0xff]  ;;  %v381_v49 = vld [vmem:[%s1376_s25 + $0x318] sm:$0xff]  ;;  %v348_v51 = vld [vmem:[%s1376_s25 + $0x210] sm:$0xff] }
  0x58   : > { %660 = vmatpush.msrb.mxu2 %v391_v9  ;;  %679 = vmatpush.msrb.mxu3 %v408_v10  ;;  %v398_v50 = vld [vmem:[%s1376_s25 + $0x3a0] sm:$0xff]  ;;  %v365_v52 = vld [vmem:[%s1376_s25 + $0x298] sm:$0xff]  ;;  %v380_v53 = vld [vmem:[%s1376_s25 + $0x310] sm:$0xff] }
  0x59   : > { %621 = vmatpush.msrb.mxu0 %v358_v11  ;;  %640 = vmatpush.msrb.mxu1 %v375_v12  ;;  %v397_v54 = vld [vmem:[%s1376_s25 + $0x398] sm:$0xff]  ;;  %v347_v55 = vld [vmem:[%s1376_s25 + $0x208] sm:$0xff]  ;;  %v364_v56 = vld [vmem:[%s1376_s25 + $0x290] sm:$0xff] }
  0x5a   : > { %661 = vmatpush.msrb.mxu2 %v390_v13  ;;  %680 = vmatpush.msrb.mxu3 %v407_v14  ;;  %v379_v57 = vld [vmem:[%s1376_s25 + $0x308] sm:$0xff]  ;;  %v396_v58 = vld [vmem:[%s1376_s25 + $0x390] sm:$0xff]  ;;  %v346_v60 = vld [vmem:[%s1376_s25 + $0x200] sm:$0xff] }
  0x5b   : > { %622 = vmatpush.msrb.mxu0 %v357_v15  ;;  %641 = vmatpush.msrb.mxu1 %v374_v16  ;;  %v268_v59 = vld [vmem:[%s1369_s21 + $0x10] sm:$0xff]  ;;  %v363_v61 = vld [vmem:[%s1376_s25 + $0x288] sm:$0xff]  ;;  %v378_v62 = vld [vmem:[%s1376_s25 + $0x300] sm:$0xff] }
  0x5c   : > { %662 = vmatpush.msrb.mxu2 %v389_v17  ;;  %681 = vmatpush.msrb.mxu3 %v406_v18  ;;  %v395_v63 = vld [vmem:[%s1376_s25 + $0x388] sm:$0xff]  ;;  %v266_v0 = vld [vmem:[%s1369_s21] sm:$0xff]  ;;  %v269_v1 = vld [vmem:[%s1369_s21 + $0x18] sm:$0xff] }
  0x5d   : > { %623 = vmatpush.msrb.mxu0 %v356_v19  ;;  %642 = vmatpush.msrb.mxu1 %v373_v20  ;;  %v425_v2 = vld [vmem:[%s1376_s25 + $0x478] sm:$0xff]  ;;  %v362_v4 = vld [vmem:[%s1376_s25 + $0x280] sm:$0xff]  ;;  %v267_v6 = vld [vmem:[%s1369_s21 + $0x8] sm:$0xff] }
  0x5e   : > { %663 = vmatpush.msrb.mxu2 %v388_v21  ;;  %682 = vmatpush.msrb.mxu3 %v405_v22  ;;  %v457_v3 = vld [vmem:[%s1376_s25 + $0x578] sm:$0xff]  ;;  %v394_v5 = vld [vmem:[%s1376_s25 + $0x380] sm:$0xff]  ;;  %v424_v7 = vld [vmem:[%s1376_s25 + $0x470] sm:$0xff] }
  0x5f   : > { %624 = vmatpush.msrb.mxu0 %v355_v23  ;;  %643 = vmatpush.msrb.mxu1 %v372_v24  ;;  %v441_v8 = vld [vmem:[%s1376_s25 + $0x4f8] sm:$0xff]  ;;  %v456_v9 = vld [vmem:[%s1376_s25 + $0x570] sm:$0xff]  ;;  %v423_v11 = vld [vmem:[%s1376_s25 + $0x468] sm:$0xff] }
  0x60   : > { %664 = vmatpush.msrb.mxu2 %v387_v25  ;;  %683 = vmatpush.msrb.mxu3 %v404_v26  ;;  %v473_v10 = vld [vmem:[%s1376_s25 + $0x5f8] sm:$0xff]  ;;  %v440_v12 = vld [vmem:[%s1376_s25 + $0x4f0] sm:$0xff]  ;;  %v455_v13 = vld [vmem:[%s1376_s25 + $0x568] sm:$0xff] }
  0x61   : > { %625 = vmatpush.msrb.mxu0 %v354_v27  ;;  %644 = vmatpush.msrb.mxu1 %v371_v28  ;;  %v472_v14 = vld [vmem:[%s1376_s25 + $0x5f0] sm:$0xff]  ;;  %v422_v16 = vld [vmem:[%s1376_s25 + $0x460] sm:$0xff]  ;;  %v439_v17 = vld [vmem:[%s1376_s25 + $0x4e8] sm:$0xff] }
  0x62   : > { %665 = vmatpush.msrb.mxu2 %v386_v29  ;;  %684 = vmatpush.msrb.mxu3 %v403_v30  ;;  %v272_v15 = vld [vmem:[%s1369_s21 + $0x30] sm:$0xff]  ;;  %v454_v18 = vld [vmem:[%s1376_s25 + $0x560] sm:$0xff]  ;;  %v471_v19 = vld [vmem:[%s1376_s25 + $0x5e8] sm:$0xff] }
  0x63   : > { %626 = vmatpush.msrb.mxu0 %v353_v31  ;;  %645 = vmatpush.msrb.mxu1 %v370_v32  ;;  %v270_v20 = vld [vmem:[%s1369_s21 + $0x20] sm:$0xff]  ;;  %v273_v21 = vld [vmem:[%s1369_s21 + $0x38] sm:$0xff]  ;;  %v271_v26 = vld [vmem:[%s1369_s21 + $0x28] sm:$0xff] }
  0x64   : > { %666 = vmatpush.msrb.mxu2 %v385_v33  ;;  %685 = vmatpush.msrb.mxu3 %v402_v34  ;;  %v421_v22 = vld [vmem:[%s1376_s25 + $0x458] sm:$0xff]  ;;  %v438_v23 = vld [vmem:[%s1376_s25 + $0x4e0] sm:$0xff]  ;;  %v420_v27 = vld [vmem:[%s1376_s25 + $0x450] sm:$0xff] }
  0x65   : > { %627 = vmatpush.msrb.mxu0 %v352_v35  ;;  %646 = vmatpush.msrb.mxu1 %v369_v36  ;;  %v453_v24 = vld [vmem:[%s1376_s25 + $0x558] sm:$0xff]  ;;  %v470_v25 = vld [vmem:[%s1376_s25 + $0x5e0] sm:$0xff]  ;;  %v452_v29 = vld [vmem:[%s1376_s25 + $0x550] sm:$0xff] }
  0x66   : > { %667 = vmatpush.msrb.mxu2 %v384_v37  ;;  %686 = vmatpush.msrb.mxu3 %v401_v38  ;;  %v437_v28 = vld [vmem:[%s1376_s25 + $0x4d8] sm:$0xff]  ;;  %v419_v31 = vld [vmem:[%s1376_s25 + $0x448] sm:$0xff]  ;;  %v436_v32 = vld [vmem:[%s1376_s25 + $0x4d0] sm:$0xff] }
  0x67   : > { %628 = vmatpush.msrb.mxu0 %v351_v39  ;;  %647 = vmatpush.msrb.mxu1 %v368_v40  ;;  %v469_v30 = vld [vmem:[%s1376_s25 + $0x5d8] sm:$0xff]  ;;  %v451_v33 = vld [vmem:[%s1376_s25 + $0x548] sm:$0xff]  ;;  %v468_v34 = vld [vmem:[%s1376_s25 + $0x5d0] sm:$0xff] }
  0x68   : > { %668 = vmatpush.msrb.mxu2 %v383_v41  ;;  %687 = vmatpush.msrb.mxu3 %v400_v42  ;;  %v418_v35 = vld [vmem:[%s1376_s25 + $0x440] sm:$0xff]  ;;  %v435_v36 = vld [vmem:[%s1376_s25 + $0x4c8] sm:$0xff]  ;;  %v417_v39 = vld [vmem:[%s1376_s25 + $0x438] sm:$0xff] }
  0x69   : > { %629 = vmatpush.msrb.mxu0 %v350_v43  ;;  %648 = vmatpush.msrb.mxu1 %v367_v44  ;;  %v450_v37 = vld [vmem:[%s1376_s25 + $0x540] sm:$0xff]  ;;  %v467_v38 = vld [vmem:[%s1376_s25 + $0x5c8] sm:$0xff]  ;;  %v449_v41 = vld [vmem:[%s1376_s25 + $0x538] sm:$0xff] }
  0x6a   : > { %669 = vmatpush.msrb.mxu2 %v382_v45  ;;  %688 = vmatpush.msrb.mxu3 %v399_v46  ;;  %v434_v40 = vld [vmem:[%s1376_s25 + $0x4c0] sm:$0xff]  ;;  %v416_v43 = vld [vmem:[%s1376_s25 + $0x430] sm:$0xff]  ;;  %v433_v44 = vld [vmem:[%s1376_s25 + $0x4b8] sm:$0xff] }
  0x6b   : > { %630 = vmatpush.msrb.mxu0 %v349_v47  ;;  %649 = vmatpush.msrb.mxu1 %v366_v48  ;;  %v466_v42 = vld [vmem:[%s1376_s25 + $0x5c0] sm:$0xff]  ;;  %v448_v45 = vld [vmem:[%s1376_s25 + $0x530] sm:$0xff]  ;;  %v465_v46 = vld [vmem:[%s1376_s25 + $0x5b8] sm:$0xff] }
  0x6c   : > { %670 = vmatpush.msrb.mxu2 %v381_v49  ;;  %689 = vmatpush.msrb.mxu3 %v398_v50  ;;  %v415_v47 = vld [vmem:[%s1376_s25 + $0x428] sm:$0xff]  ;;  %v432_v48 = vld [vmem:[%s1376_s25 + $0x4b0] sm:$0xff] }
  0x6d   : > { %631 = vmatpush.msrb.mxu0 %v348_v51  ;;  %650 = vmatpush.msrb.mxu1 %v365_v52  ;;  %v447_v49 = vld [vmem:[%s1376_s25 + $0x528] sm:$0xff]  ;;  %v464_v50 = vld [vmem:[%s1376_s25 + $0x5b0] sm:$0xff]  ;;  %v414_v51 = vld [vmem:[%s1376_s25 + $0x420] sm:$0xff] }
  0x6e   : > { %671 = vmatpush.msrb.mxu2 %v380_v53  ;;  %690 = vmatpush.msrb.mxu3 %v397_v54  ;;  %v431_v52 = vld [vmem:[%s1376_s25 + $0x4a8] sm:$0xff]  ;;  %v446_v53 = vld [vmem:[%s1376_s25 + $0x520] sm:$0xff] }
  0x6f   : > { %632 = vmatpush.msrb.mxu0 %v347_v55  ;;  %651 = vmatpush.msrb.mxu1 %v364_v56  ;;  %v463_v54 = vld [vmem:[%s1376_s25 + $0x5a8] sm:$0xff]  ;;  %v413_v55 = vld [vmem:[%s1376_s25 + $0x418] sm:$0xff]  ;;  %v430_v56 = vld [vmem:[%s1376_s25 + $0x4a0] sm:$0xff] }
  0x70   : > { %672 = vmatpush.msrb.mxu2 %v379_v57  ;;  %691 = vmatpush.msrb.mxu3 %v396_v58  ;;  %v445_v57 = vld [vmem:[%s1376_s25 + $0x518] sm:$0xff]  ;;  %v462_v58 = vld [vmem:[%s1376_s25 + $0x5a0] sm:$0xff] }
  0x71   : > { %594 = vmatmul.f32.vlgmr.msra.gmra.mxu2 %v268_v59  ;;  %633 = vmatpush.msrb.mxu0 %v346_v60  ;;  %v412_v59 = vld [vmem:[%s1376_s25 + $0x410] sm:$0xff]  ;;  %v429_v60 = vld [vmem:[%s1376_s25 + $0x498] sm:$0xff] }
  0x72   : > { %652 = vmatpush.msrb.mxu1 %v363_v61  ;;  %673 = vmatpush.msrb.mxu2 %v378_v62  ;;  %v444_v61 = vld [vmem:[%s1376_s25 + $0x510] sm:$0xff]  ;;  %v461_v62 = vld [vmem:[%s1376_s25 + $0x598] sm:$0xff] }
  0x73   : > { %692 = vmatpush.msrb.mxu3 %v395_v63  ;;  %554 = vmatmul.f32.vlgmr.msra.gmra.mxu0 %v266_v0  ;;  %v411_v63 = vld [vmem:[%s1376_s25 + $0x408] sm:$0xff]  ;;  %v428_v0 = vld [vmem:[%s1376_s25 + $0x490] sm:$0xff] }
  0x74   : > { %614 = vmatmul.f32.vlgmr.msra.gmra.mxu3 %v269_v1  ;;  %698 = vmatpush.msra.mxu0 %v425_v2  ;;  %v443_v1 = vld [vmem:[%s1376_s25 + $0x508] sm:$0xff]  ;;  %v460_v2 = vld [vmem:[%s1376_s25 + $0x590] sm:$0xff] }
  0x75   : > { %738 = vmatpush.msra.mxu2 %v457_v3  ;;  %653 = vmatpush.msrb.mxu1 %v362_v4  ;;  %v410_v3 = vld [vmem:[%s1376_s25 + $0x400] sm:$0xff]  ;;  %v427_v4 = vld [vmem:[%s1376_s25 + $0x488] sm:$0xff] }
  0x76   : > { %693 = vmatpush.msrb.mxu3 %v394_v5  ;;  %574 = vmatmul.f32.vlgmr.msra.gmra.mxu1 %v267_v6  ;;  %v442_v5 = vld [vmem:[%s1376_s25 + $0x500] sm:$0xff]  ;;  %v459_v6 = vld [vmem:[%s1376_s25 + $0x588] sm:$0xff] }
  0x77   : > { %699 = vmatpush.msra.mxu0 %v424_v7  ;;  %718 = vmatpush.msra.mxu1 %v441_v8  ;;  %v274_v7 = vld [vmem:[%s1369_s21 + $0x40] sm:$0xff]  ;;  %v276_v8 = vld [vmem:[%s1369_s21 + $0x50] sm:$0xff] }
  0x78   : > { %739 = vmatpush.msra.mxu2 %v456_v9  ;;  %758 = vmatpush.msra.mxu3 %v473_v10  ;;  %v489_v9 = vld [vmem:[%s1376_s25 + $0x678] sm:$0xff] }
  0x79   : > { %700 = vmatpush.msra.mxu0 %v423_v11  ;;  %719 = vmatpush.msra.mxu1 %v440_v12  ;;  %v521_v10 = vld [vmem:[%s1376_s25 + $0x778] sm:$0xff]  ;;  %v426_v11 = vld [vmem:[%s1376_s25 + $0x480] sm:$0xff] }
  0x7a   : > { %740 = vmatpush.msra.mxu2 %v455_v13  ;;  %759 = vmatpush.msra.mxu3 %v472_v14  ;;  %v458_v12 = vld [vmem:[%s1376_s25 + $0x580] sm:$0xff]  ;;  %v275_v13 = vld [vmem:[%s1369_s21 + $0x48] sm:$0xff]  ;;  %v277_v14 = vld [vmem:[%s1369_s21 + $0x58] sm:$0xff] }
  0x7b   : > { %674 = vmatmul.f32.vlgmr.msrb.gmra.mxu2 %v272_v15  ;;  %701 = vmatpush.msra.mxu0 %v422_v16  ;;  %v488_v15 = vld [vmem:[%s1376_s25 + $0x670] sm:$0xff]  ;;  %v505_v16 = vld [vmem:[%s1376_s25 + $0x6f8] sm:$0xff] }
  0x7c   : > { %720 = vmatpush.msra.mxu1 %v439_v17  ;;  %741 = vmatpush.msra.mxu2 %v454_v18  ;;  %v520_v17 = vld [vmem:[%s1376_s25 + $0x770] sm:$0xff]  ;;  %v537_v18 = vld [vmem:[%s1376_s25 + $0x7f8] sm:$0xff] }
  0x7d   : > { %760 = vmatpush.msra.mxu3 %v471_v19  ;;  %634 = vmatmul.f32.vlgmr.msrb.gmra.mxu0 %v270_v20  ;;  %v487_v19 = vld [vmem:[%s1376_s25 + $0x668] sm:$0xff]  ;;  %v504_v20 = vld [vmem:[%s1376_s25 + $0x6f0] sm:$0xff] }
  0x7e   : > { %694 = vmatmul.f32.vlgmr.msrb.gmra.mxu3 %v273_v21  ;;  %702 = vmatpush.msra.mxu0 %v421_v22  ;;  %v519_v21 = vld [vmem:[%s1376_s25 + $0x768] sm:$0xff]  ;;  %v536_v22 = vld [vmem:[%s1376_s25 + $0x7f0] sm:$0xff] }
  0x7f   : > { %721 = vmatpush.msra.mxu1 %v438_v23  ;;  %742 = vmatpush.msra.mxu2 %v453_v24  ;;  %v486_v23 = vld [vmem:[%s1376_s25 + $0x660] sm:$0xff]  ;;  %v503_v24 = vld [vmem:[%s1376_s25 + $0x6e8] sm:$0xff] }
  0x80   : > { %761 = vmatpush.msra.mxu3 %v470_v25  ;;  %654 = vmatmul.f32.vlgmr.msrb.gmra.mxu1 %v271_v26  ;;  %v518_v25 = vld [vmem:[%s1376_s25 + $0x760] sm:$0xff]  ;;  %v535_v26 = vld [vmem:[%s1376_s25 + $0x7e8] sm:$0xff] }
  0x81   : > { %703 = vmatpush.msra.mxu0 %v420_v27  ;;  %722 = vmatpush.msra.mxu1 %v437_v28  ;;  %v485_v27 = vld [vmem:[%s1376_s25 + $0x658] sm:$0xff]  ;;  %v502_v28 = vld [vmem:[%s1376_s25 + $0x6e0] sm:$0xff] }
  0x82   : > { %743 = vmatpush.msra.mxu2 %v452_v29  ;;  %762 = vmatpush.msra.mxu3 %v469_v30  ;;  %v517_v29 = vld [vmem:[%s1376_s25 + $0x758] sm:$0xff]  ;;  %v534_v30 = vld [vmem:[%s1376_s25 + $0x7e0] sm:$0xff] }
  0x83   : > { %704 = vmatpush.msra.mxu0 %v419_v31  ;;  %723 = vmatpush.msra.mxu1 %v436_v32  ;;  %v484_v31 = vld [vmem:[%s1376_s25 + $0x650] sm:$0xff]  ;;  %v501_v32 = vld [vmem:[%s1376_s25 + $0x6d8] sm:$0xff] }
  0x84   : > { %744 = vmatpush.msra.mxu2 %v451_v33  ;;  %763 = vmatpush.msra.mxu3 %v468_v34  ;;  %v516_v33 = vld [vmem:[%s1376_s25 + $0x750] sm:$0xff]  ;;  %v533_v34 = vld [vmem:[%s1376_s25 + $0x7d8] sm:$0xff] }
  0x85   : > { %705 = vmatpush.msra.mxu0 %v418_v35  ;;  %724 = vmatpush.msra.mxu1 %v435_v36  ;;  %v483_v35 = vld [vmem:[%s1376_s25 + $0x648] sm:$0xff]  ;;  %v500_v36 = vld [vmem:[%s1376_s25 + $0x6d0] sm:$0xff] }
  0x86   : > { %745 = vmatpush.msra.mxu2 %v450_v37  ;;  %764 = vmatpush.msra.mxu3 %v467_v38  ;;  %v515_v37 = vld [vmem:[%s1376_s25 + $0x748] sm:$0xff]  ;;  %v532_v38 = vld [vmem:[%s1376_s25 + $0x7d0] sm:$0xff] }
  0x87   : > { %706 = vmatpush.msra.mxu0 %v417_v39  ;;  %725 = vmatpush.msra.mxu1 %v434_v40  ;;  %v482_v39 = vld [vmem:[%s1376_s25 + $0x640] sm:$0xff]  ;;  %v499_v40 = vld [vmem:[%s1376_s25 + $0x6c8] sm:$0xff] }
  0x88   : > { %746 = vmatpush.msra.mxu2 %v449_v41  ;;  %765 = vmatpush.msra.mxu3 %v466_v42  ;;  %v514_v41 = vld [vmem:[%s1376_s25 + $0x740] sm:$0xff]  ;;  %v531_v42 = vld [vmem:[%s1376_s25 + $0x7c8] sm:$0xff] }
  0x89   : > { %707 = vmatpush.msra.mxu0 %v416_v43  ;;  %726 = vmatpush.msra.mxu1 %v433_v44  ;;  %v481_v43 = vld [vmem:[%s1376_s25 + $0x638] sm:$0xff]  ;;  %v498_v44 = vld [vmem:[%s1376_s25 + $0x6c0] sm:$0xff] }
  0x8a   : > { %747 = vmatpush.msra.mxu2 %v448_v45  ;;  %766 = vmatpush.msra.mxu3 %v465_v46  ;;  %v513_v45 = vld [vmem:[%s1376_s25 + $0x738] sm:$0xff]  ;;  %v530_v46 = vld [vmem:[%s1376_s25 + $0x7c0] sm:$0xff] }
  0x8b   : > { %708 = vmatpush.msra.mxu0 %v415_v47  ;;  %727 = vmatpush.msra.mxu1 %v432_v48  ;;  %v480_v47 = vld [vmem:[%s1376_s25 + $0x630] sm:$0xff]  ;;  %v497_v48 = vld [vmem:[%s1376_s25 + $0x6b8] sm:$0xff] }
  0x8c   : > { %748 = vmatpush.msra.mxu2 %v447_v49  ;;  %767 = vmatpush.msra.mxu3 %v464_v50  ;;  %v512_v49 = vld [vmem:[%s1376_s25 + $0x730] sm:$0xff]  ;;  %v529_v50 = vld [vmem:[%s1376_s25 + $0x7b8] sm:$0xff] }
  0x8d   : > { %709 = vmatpush.msra.mxu0 %v414_v51  ;;  %728 = vmatpush.msra.mxu1 %v431_v52  ;;  %v479_v51 = vld [vmem:[%s1376_s25 + $0x628] sm:$0xff]  ;;  %v496_v52 = vld [vmem:[%s1376_s25 + $0x6b0] sm:$0xff] }
  0x8e   : > { %749 = vmatpush.msra.mxu2 %v446_v53  ;;  %768 = vmatpush.msra.mxu3 %v463_v54  ;;  %v511_v53 = vld [vmem:[%s1376_s25 + $0x728] sm:$0xff]  ;;  %v528_v54 = vld [vmem:[%s1376_s25 + $0x7b0] sm:$0xff] }
  0x8f   : > { %710 = vmatpush.msra.mxu0 %v413_v55  ;;  %729 = vmatpush.msra.mxu1 %v430_v56  ;;  %v478_v55 = vld [vmem:[%s1376_s25 + $0x620] sm:$0xff]  ;;  %v495_v56 = vld [vmem:[%s1376_s25 + $0x6a8] sm:$0xff] }
  0x90   : > { %750 = vmatpush.msra.mxu2 %v445_v57  ;;  %769 = vmatpush.msra.mxu3 %v462_v58  ;;  %v510_v57 = vld [vmem:[%s1376_s25 + $0x720] sm:$0xff]  ;;  %v527_v58 = vld [vmem:[%s1376_s25 + $0x7a8] sm:$0xff] }
  0x91   : > { %711 = vmatpush.msra.mxu0 %v412_v59  ;;  %730 = vmatpush.msra.mxu1 %v429_v60  ;;  %v477_v59 = vld [vmem:[%s1376_s25 + $0x618] sm:$0xff]  ;;  %v494_v60 = vld [vmem:[%s1376_s25 + $0x6a0] sm:$0xff] }
  0x92   : > { %751 = vmatpush.msra.mxu2 %v444_v61  ;;  %770 = vmatpush.msra.mxu3 %v461_v62  ;;  %v509_v61 = vld [vmem:[%s1376_s25 + $0x718] sm:$0xff]  ;;  %v526_v62 = vld [vmem:[%s1376_s25 + $0x7a0] sm:$0xff] }
  0x93   : > { %712 = vmatpush.msra.mxu0 %v411_v63  ;;  %731 = vmatpush.msra.mxu1 %v428_v0  ;;  %v476_v63 = vld [vmem:[%s1376_s25 + $0x610] sm:$0xff]  ;;  %v493_v0 = vld [vmem:[%s1376_s25 + $0x698] sm:$0xff] }
  0x94   : > { %752 = vmatpush.msra.mxu2 %v443_v1  ;;  %771 = vmatpush.msra.mxu3 %v460_v2  ;;  %v508_v1 = vld [vmem:[%s1376_s25 + $0x710] sm:$0xff]  ;;  %v525_v2 = vld [vmem:[%s1376_s25 + $0x798] sm:$0xff] }
  0x95   : > { %713 = vmatpush.msra.mxu0 %v410_v3  ;;  %732 = vmatpush.msra.mxu1 %v427_v4  ;;  %v475_v3 = vld [vmem:[%s1376_s25 + $0x608] sm:$0xff]  ;;  %v492_v4 = vld [vmem:[%s1376_s25 + $0x690] sm:$0xff] }
  0x96   : > { %753 = vmatpush.msra.mxu2 %v442_v5  ;;  %772 = vmatpush.msra.mxu3 %v459_v6  ;;  %v507_v5 = vld [vmem:[%s1376_s25 + $0x708] sm:$0xff]  ;;  %v524_v6 = vld [vmem:[%s1376_s25 + $0x790] sm:$0xff] }
  0x97   : > { %714 = vmatmul.f32.vlgmr.msra.gmra.mxu0 %v274_v7  ;;  %754 = vmatmul.f32.vlgmr.msra.gmra.mxu2 %v276_v8  ;;  %v474_v7 = vld [vmem:[%s1376_s25 + $0x600] sm:$0xff]  ;;  %v491_v8 = vld [vmem:[%s1376_s25 + $0x688] sm:$0xff] }
  0x98   : > { %778 = vmatpush.msrb.mxu0 %v489_v9  ;;  %818 = vmatpush.msrb.mxu2 %v521_v10  ;;  %v506_v9 = vld [vmem:[%s1376_s25 + $0x700] sm:$0xff]  ;;  %v523_v10 = vld [vmem:[%s1376_s25 + $0x788] sm:$0xff] }
  0x99   : > { %733 = vmatpush.msra.mxu1 %v426_v11  ;;  %773 = vmatpush.msra.mxu3 %v458_v12  ;;  %v278_v11 = vld [vmem:[%s1369_s21 + $0x60] sm:$0xff]  ;;  %v280_v12 = vld [vmem:[%s1369_s21 + $0x70] sm:$0xff] }
  0x9a   : > { %734 = vmatmul.f32.vlgmr.msra.gmra.mxu1 %v275_v13  ;;  %774 = vmatmul.f32.vlgmr.msra.gmra.mxu3 %v277_v14  ;;  %v490_v13 = vld [vmem:[%s1376_s25 + $0x680] sm:$0xff] }
  0x9b   : > { %779 = vmatpush.msrb.mxu0 %v488_v15  ;;  %798 = vmatpush.msrb.mxu1 %v505_v16  ;;  %v522_v14 = vld [vmem:[%s1376_s25 + $0x780] sm:$0xff]  ;;  %v279_v15 = vld [vmem:[%s1369_s21 + $0x68] sm:$0xff]  ;;  %v281_v16 = vld [vmem:[%s1369_s21 + $0x78] sm:$0xff] }
  0x9c   : > { %819 = vmatpush.msrb.mxu2 %v520_v17  ;;  %838 = vmatpush.msrb.mxu3 %v537_v18 }
  0x9d   : > { %780 = vmatpush.msrb.mxu0 %v487_v19  ;;  %799 = vmatpush.msrb.mxu1 %v504_v20 }
  0x9e   : > { %820 = vmatpush.msrb.mxu2 %v519_v21  ;;  %839 = vmatpush.msrb.mxu3 %v536_v22 }
  0x9f   : > { %781 = vmatpush.msrb.mxu0 %v486_v23  ;;  %800 = vmatpush.msrb.mxu1 %v503_v24 }
  0xa0   : > { %821 = vmatpush.msrb.mxu2 %v518_v25  ;;  %840 = vmatpush.msrb.mxu3 %v535_v26 }
  0xa1   : > { %782 = vmatpush.msrb.mxu0 %v485_v27  ;;  %801 = vmatpush.msrb.mxu1 %v502_v28 }
  0xa2   : > { %822 = vmatpush.msrb.mxu2 %v517_v29  ;;  %841 = vmatpush.msrb.mxu3 %v534_v30 }
  0xa3   : > { %783 = vmatpush.msrb.mxu0 %v484_v31  ;;  %802 = vmatpush.msrb.mxu1 %v501_v32 }
  0xa4   : > { %823 = vmatpush.msrb.mxu2 %v516_v33  ;;  %842 = vmatpush.msrb.mxu3 %v533_v34 }
  0xa5   : > { %784 = vmatpush.msrb.mxu0 %v483_v35  ;;  %803 = vmatpush.msrb.mxu1 %v500_v36 }
  0xa6   : > { %824 = vmatpush.msrb.mxu2 %v515_v37  ;;  %843 = vmatpush.msrb.mxu3 %v532_v38 }
  0xa7   : > { %785 = vmatpush.msrb.mxu0 %v482_v39  ;;  %804 = vmatpush.msrb.mxu1 %v499_v40 }
  0xa8   : > { %825 = vmatpush.msrb.mxu2 %v514_v41  ;;  %844 = vmatpush.msrb.mxu3 %v531_v42 }
  0xa9   : > { %786 = vmatpush.msrb.mxu0 %v481_v43  ;;  %805 = vmatpush.msrb.mxu1 %v498_v44 }
  0xaa   : > { %826 = vmatpush.msrb.mxu2 %v513_v45  ;;  %845 = vmatpush.msrb.mxu3 %v530_v46  ;;  %v265_v46 = vld [vmem:[#allocation8] sm:$0xff] }
  0xab   : > { %787 = vmatpush.msrb.mxu0 %v480_v47  ;;  %806 = vmatpush.msrb.mxu1 %v497_v48 }
  0xac   : > { %827 = vmatpush.msrb.mxu2 %v512_v49  ;;  %846 = vmatpush.msrb.mxu3 %v529_v50 }
  0xad   : > { %788 = vmatpush.msrb.mxu0 %v479_v51  ;;  %807 = vmatpush.msrb.mxu1 %v496_v52 }
  0xae   : > { %828 = vmatpush.msrb.mxu2 %v511_v53  ;;  %847 = vmatpush.msrb.mxu3 %v528_v54 }
  0xaf   : > { %789 = vmatpush.msrb.mxu0 %v478_v55  ;;  %808 = vmatpush.msrb.mxu1 %v495_v56 }
  0xb0   : > { %829 = vmatpush.msrb.mxu2 %v510_v57  ;;  %848 = vmatpush.msrb.mxu3 %v527_v58 }
  0xb1   : > { %790 = vmatpush.msrb.mxu0 %v477_v59  ;;  %809 = vmatpush.msrb.mxu1 %v494_v60 }
  0xb2   : > { %830 = vmatpush.msrb.mxu2 %v509_v61  ;;  %849 = vmatpush.msrb.mxu3 %v526_v62 }
  0xb3   : > { %791 = vmatpush.msrb.mxu0 %v476_v63  ;;  %810 = vmatpush.msrb.mxu1 %v493_v0 }
  0xb4   : > { %831 = vmatpush.msrb.mxu2 %v508_v1  ;;  %850 = vmatpush.msrb.mxu3 %v525_v2 }
  0xb5   : > { %792 = vmatpush.msrb.mxu0 %v475_v3  ;;  %811 = vmatpush.msrb.mxu1 %v492_v4 }
  0xb6   : > { %832 = vmatpush.msrb.mxu2 %v507_v5  ;;  %851 = vmatpush.msrb.mxu3 %v524_v6 }
  0xb7   : > { %793 = vmatpush.msrb.mxu0 %v474_v7  ;;  %812 = vmatpush.msrb.mxu1 %v491_v8 }
  0xb8   : > { %833 = vmatpush.msrb.mxu2 %v506_v9  ;;  %852 = vmatpush.msrb.mxu3 %v523_v10 }
  0xb9   : > { %794 = vmatmul.f32.vlgmr.msrb.gmra.mxu0 %v278_v11  ;;  %834 = vmatmul.f32.vlgmr.msrb.gmra.mxu2 %v280_v12 }
  0xba   : > { %813 = vmatpush.msrb.mxu1 %v490_v13  ;;  %853 = vmatpush.msrb.mxu3 %v522_v14 }
  0xbb   : > { %814 = vmatmul.f32.vlgmr.msrb.gmra.mxu1 %v279_v15  ;;  %854 = vmatmul.f32.vlgmr.msrb.gmra.mxu3 %v281_v16 }
  0xf0   : > { %v555_v18 = vpop.f32.mrf.mxu0 }
  0xf3   : > { %v575_v17 = vpop.f32.mrf.mxu1 }
  0xf4   : > { %v576_v19 = vadd.f32 %v575_v17, %v555_v18  ;;  %v595_v20 = vpop.f32.mrf.mxu2 }
  0xf6   : > { %v596_v21 = vadd.f32 %v595_v20, %v576_v19 }
  0xf7   : > { %v615_v22 = vpop.f32.mrf.mxu3 }
  0xf8   : > { %v616_v23 = vadd.f32 %v615_v22, %v596_v21 }
  0xfa   : > { %v635_v24 = vpop.f32.mrf.mxu0 }
  0xfb   : > { %v636_v25 = vadd.f32 %v635_v24, %v616_v23 }
  0xfd   : > { %v655_v26 = vpop.f32.mrf.mxu1 }
  0xfe   : > { %v656_v27 = vadd.f32 %v655_v26, %v636_v25  ;;  %v675_v28 = vpop.f32.mrf.mxu2 }
 0x100   : > { %v676_v29 = vadd.f32 %v675_v28, %v656_v27 }
 0x101   : > { %v695_v30 = vpop.f32.mrf.mxu3 }
 0x102   : > { %v696_v32 = vadd.f32 %v695_v30, %v676_v29 }
 0x114   : > { %v715_v31 = vpop.f32.mrf.mxu0 }
 0x115   : > { %v716_v33 = vadd.f32 %v715_v31, %v696_v32 }
 0x117   : > { %v735_v34 = vpop.f32.mrf.mxu1 }
 0x118   : > { %v736_v36 = vadd.f32 %v735_v34, %v716_v33 }
 0x11a   : > { %v755_v35 = vpop.f32.mrf.mxu2 }
 0x11b   : > { %v756_v37 = vadd.f32 %v755_v35, %v736_v36 }
 0x11d   : > { %v775_v38 = vpop.f32.mrf.mxu3 }
 0x11e   : > { %v776_v39 = vadd.f32 %v775_v38, %v756_v37 }
 0x136   : > { %v795_v40 = vpop.f32.mrf.mxu0 }
 0x137   : > { %v796_v41 = vadd.f32 %v795_v40, %v776_v39 }
 0x138   : > { %v815_v42 = vpop.f32.mrf.mxu1 }
 0x139   : > { %v816_v43 = vadd.f32 %v815_v42, %v796_v41 }
 0x13c   : > { %v835_v44 = vpop.f32.mrf.mxu2 }
 0x13d   : > { %v836_v45 = vadd.f32 %v835_v44, %v816_v43 }
 0x13e   : > { %v855_v47 = vpop.f32.mrf.mxu3 }
 0x13f   : > { %v856_v48 = vadd.f32 %v855_v47, %v836_v45 }
 0x141   : > { %v858_v49 = vadd.f32 %v856_v48, %v265_v46 }
 0x143   : > { %859 = vst [vmem:[#allocation8] sm:$0xff] %v858_v49 }
 0x144   : > { %997 = dma.vmem_to_hbm [thread:$0]  (%p1014_p1), %s869_s19, 128, %s871_s29, [#allocation4]  }
 0x145   : > { %1224 = dma.done.wait (%p1014_p1), [#allocation4], 128  }
 0x146   : > { %1226 = vsyncadd (%p1014_p1), [#allocation4], 4294967168 }
 0x147 PF: > { %s20_s17 = sadd.s32 1, %s1249_s17   ;;  %s1689_s12 = smov %s1233_s13 }
 0x148   : > { %p17_p3 = scmp.ge.s32.totalorder %s20_s17, 6   ;;  %s1690_s13 = smov %s1237_s14 }
 0x149   : > { %s1691_s14 = smov %s1344_s6  ;;  %s1692_s15 = smov %s1245_s16 }
 0x14a   : > { %s1693_s16 = smov %s1695_s26  ;;  %19 = sbr.rel (!%p17_p3) target bundleno = 7 (0x7), region = 91 }
 0x14f   :  { %884 = vsyncpa [#allocation3], 1 }
 0x150   :  { %886 = vsyncpa [#allocation3 + $0x1], 1 }
 0x151   :  { %887 = vsyncpa [#allocation6], 1 }
 0x152   :  { %889 = vsyncpa [#allocation6 + $0x1], 1 }
 0x153   :  { %890 = vsyncpa [#allocation4], 1 }
 0x154   :  { %892 = vsyncpa [#allocation4 + $0x1], 1 }

</bundles_post_ra>
